<compile_context>
chip_gen: v7x
topology: tpu7x:2x2x1
jax: 0.10.0
libtpu: 0.0.40
codegen_flags: <defaults>
</compile_context>

<pallas_src>
import functools

import jax
import jax.numpy as jnp
from jax import lax
from jax.experimental import pallas as pl
from jax.experimental.pallas import tpu as pltpu

_HIGH = lax.Precision.HIGHEST


def gru_chunk_kernel(gi_r_ref, gi_z_ref, gi_n_ref,
                     whr_ref, whz_ref, whn_ref, bhn_ref,
                     h_out_ref, h_scr):
    """Run T_CHUNK GRU steps of the recurrence (gate order r, z, n).

    gi_*_ref : (T_CHUNK, B, H) precomputed input projections.
               gi_r / gi_z already include b_ir+b_hr / b_iz+b_hz; gi_n has b_in.
    wh*_ref  : (H, H)   hidden->hidden weights, pre-transposed, pre-split.
    bhn_ref  : (1, H)   b_hn (must stay separate: it is gated by r).
    h_out_ref: (T_CHUNK, B, H) hidden state for every step of this chunk.
    h_scr    : (B, H)   VMEM scratch carrying hidden state across chunks.
    """
    c = pl.program_id(0)

    @pl.when(c == 0)
    def _():
        h_scr[...] = jnp.zeros_like(h_scr)

    # Hoisted out of the unrolled loop: constant weights / bias broadcast.
    whr = whr_ref[...]
    whz = whz_ref[...]
    whn = whn_ref[...]
    bhn = bhn_ref[...]

    t_chunk = gi_r_ref.shape[0]

    def step(t, h):
        gr = gi_r_ref[t]                                    # (B, H)
        gz = gi_z_ref[t]
        gn = gi_n_ref[t]
        r = jax.nn.sigmoid(
            gr + jnp.dot(h, whr, preferred_element_type=jnp.float32))
        z = jax.nn.sigmoid(
            gz + jnp.dot(h, whz, preferred_element_type=jnp.float32))
        n = jnp.tanh(
            gn + r * (jnp.dot(h, whn, preferred_element_type=jnp.float32) + bhn))
        h_new = (1.0 - z) * n + z * h
        h_out_ref[t] = h_new
        return h_new

    h_final = lax.fori_loop(0, t_chunk, step, h_scr[...], unroll=True)
    h_scr[...] = h_final


def gru_net_forward(x, params, *, feature_size, hidden_size, lookback, step,
                    t_chunk=64):
    """Pallas implementation of GRUNet.forward."""
    T = lookback // step
    x = x.reshape(-1, T, feature_size).astype(jnp.float32)   # torch x.view(-1, T, F)
    S, B, F = x.shape
    H = hidden_size

    w_ih = params["w_ih"]        # (3H, F)  gates [r | z | n]
    w_hh = params["w_hh"]        # (3H, H)
    b_ih = params["b_ih"]        # (3H,)
    b_hh = params["b_hh"]        # (3H,)

    # ---- Hoist the h-independent input projection out of the serial loop:
    # one (S*B, F) @ (F, 3H) matmul on the MXU (XLA), with b_ih and the r/z
    # parts of b_hh folded in.  b_hn stays inside the kernel (gated by r).
    bias = b_ih + jnp.concatenate(
        [b_hh[:2 * H], jnp.zeros((H,), jnp.float32)])
    gi = (jnp.dot(x.reshape(S * B, F), w_ih.T,
                  precision=_HIGH, preferred_element_type=jnp.float32)
          + bias).reshape(S, B, 3 * H)

    # ---- Pre-split gates host-side (no in-kernel cross-lane slicing).
    gi_r = gi[:, :, 0:H]
    gi_z = gi[:, :, H:2 * H]
    gi_n = gi[:, :, 2 * H:3 * H]
    whr_t = w_hh[0:H].T                    # (H, H)
    whz_t = w_hh[H:2 * H].T
    whn_t = w_hh[2 * H:3 * H].T
    b_hn = b_hh[2 * H:3 * H].reshape(1, H)

    # ---- Chunk the (sequential) sequence axis; pad at the end if needed.
    # Padding steps run after all real steps, so they cannot corrupt h.
    tc = min(t_chunk, S)
    n_chunks = pl.cdiv(S, tc)
    s_pad = n_chunks * tc
    if s_pad != S:
        pad = ((0, s_pad - S), (0, 0), (0, 0))
        gi_r = jnp.pad(gi_r, pad)
        gi_z = jnp.pad(gi_z, pad)
        gi_n = jnp.pad(gi_n, pad)

    h_all = pl.pallas_call(
        gru_chunk_kernel,
        out_shape=jax.ShapeDtypeStruct((s_pad, B, H), jnp.float32),
        grid_spec=pltpu.PrefetchScalarGridSpec(
            num_scalar_prefetch=0,
            grid=(n_chunks,),
            in_specs=[
                pl.BlockSpec((tc, B, H), lambda c: (c, 0, 0)),
                pl.BlockSpec((tc, B, H), lambda c: (c, 0, 0)),
                pl.BlockSpec((tc, B, H), lambda c: (c, 0, 0)),
                # Constant weight tiles (tiny at H=32; single-buffering them is
                # a negligible win at this size, so default buffering is kept).
                pl.BlockSpec((H, H), lambda c: (0, 0)),
                pl.BlockSpec((H, H), lambda c: (0, 0)),
                pl.BlockSpec((H, H), lambda c: (0, 0)),
                pl.BlockSpec((1, H), lambda c: (0, 0)),
            ],
            out_specs=pl.BlockSpec((tc, B, H), lambda c: (c, 0, 0)),
            scratch_shapes=[pltpu.VMEM((B, H), jnp.float32)],
        ),
        compiler_params=pltpu.CompilerParams(
            dimension_semantics=("arbitrary",)),   # recurrence: sequential grid
    )(gi_r, gi_z, gi_n, whr_t, whz_t, whn_t, b_hn)

    # ---- fc deferred to XLA.  Only batch row B-1 is consumed by the module
    # (torch: fcl1(out)[:, -1, :]), and fc is elementwise over (S, B), so
    # applying it after selecting the row is bit-equivalent and cheaper.
    h_last = h_all[:S, B - 1, :]                                  # (S, H)
    y = jnp.dot(h_last, params["w_fc"].T, precision=_HIGH) + params["b_fc"]
    return y                                                      # (S, 1)


def gru_net_reference(x, params, *, feature_size, hidden_size, lookback, step):
    """Pure-JAX reference (mirrors torch.nn.GRU + nn.Linear)."""
    T = lookback // step
    x = x.reshape(-1, T, feature_size).astype(jnp.float32)
    S, B, F = x.shape
    H = hidden_size
    w_ih, w_hh = params["w_ih"], params["w_hh"]
    b_ih, b_hh = params["b_ih"], params["b_hh"]

    h = jnp.zeros((B, H), jnp.float32)
    outs = []
    for t in range(S):
        gi = jnp.dot(x[t], w_ih.T, precision=_HIGH) + b_ih
        gh = jnp.dot(h, w_hh.T, precision=_HIGH) + b_hh
        r = jax.nn.sigmoid(gi[:, :H] + gh[:, :H])
        z = jax.nn.sigmoid(gi[:, H:2 * H] + gh[:, H:2 * H])
        n = jnp.tanh(gi[:, 2 * H:] + r * gh[:, 2 * H:])
        h = (1.0 - z) * n + z * h
        outs.append(h)
    out = jnp.stack(outs, axis=0)                                   # (S, B, H)
    y = jnp.dot(out, params["w_fc"].T, precision=_HIGH) + params["b_fc"]
    return y[:, -1, :]


def init_params(key, feature_size, hidden_size):
    """Deterministic init, matching PyTorch's U(-1/sqrt(H), 1/sqrt(H)) scheme."""
    H, F = hidden_size, feature_size
    k = 1.0 / (H ** 0.5)
    ks = jax.random.split(key, 6)
    u = lambda kk, shape: jax.random.uniform(kk, shape, jnp.float32, -k, k)
    return {
        "w_ih": u(ks[0], (3 * H, F)),   # [W_ir; W_iz; W_in]
        "w_hh": u(ks[1], (3 * H, H)),   # [W_hr; W_hz; W_hn]
        "b_ih": u(ks[2], (3 * H,)),
        "b_hh": u(ks[3], (3 * H,)),
        "w_fc": u(ks[4], (1, H)),       # fcl1 weight
        "b_fc": u(ks[5], (1,)),         # fcl1 bias
    }


if __name__ == "__main__":
    feature_size, hidden_size, lookback, step = 4, 32, 8, 1
    T = lookback // step

    key = jax.random.PRNGKey(0)
    kx, kp, kx2 = jax.random.split(key, 3)
    params = init_params(kp, feature_size, hidden_size)

    fwd = functools.partial(gru_net_forward, feature_size=feature_size,
                            hidden_size=hidden_size, lookback=lookback, step=step)
    ref = functools.partial(gru_net_reference, feature_size=feature_size,
                            hidden_size=hidden_size, lookback=lookback, step=step)

    # Small shape consistent with the module (batch=2 samples, T=8, F=4, H=32).
    batch = 2
    x = jax.random.normal(kx, (batch, T, feature_size), jnp.float32)
    out = jax.block_until_ready(fwd(x, params))
    r = ref(x, params)
    assert out.shape == (batch, 1), out.shape
    assert jnp.allclose(out, r, atol=1e-4, rtol=1e-4), (out, r)

    # Extra check exercising the multi-chunk + padded path of the recurrence.
    batch2 = 80                      # -> 2 grid chunks of 64 with 48 padded steps
    x2 = jax.random.normal(kx2, (batch2, T, feature_size), jnp.float32)
    out2 = jax.block_until_ready(fwd(x2, params))
    r2 = ref(x2, params)
    assert out2.shape == (batch2, 1), out2.shape
    assert jnp.allclose(out2, r2, atol=1e-4, rtol=1e-4), (out2, r2)

    print("KERNEL_OK")
</pallas_src>

<mosaic_0001>
module attributes {stable_mosaic.version = 11 : i64} {
  func.func @gru_chunk_kernel(%arg0: i32, %arg1: memref<2x8x32xf32, #tpu.memory_space<vmem>>, %arg2: memref<2x8x32xf32, #tpu.memory_space<vmem>>, %arg3: memref<2x8x32xf32, #tpu.memory_space<vmem>>, %arg4: memref<32x32xf32, #tpu.memory_space<vmem>>, %arg5: memref<32x32xf32, #tpu.memory_space<vmem>>, %arg6: memref<32x32xf32, #tpu.memory_space<vmem>>, %arg7: memref<1x32xf32, #tpu.memory_space<vmem>>, %arg8: memref<2x8x32xf32, #tpu.memory_space<vmem>>, %arg9: memref<8x32xf32, #tpu.memory_space<vmem>>) attributes {dimension_semantics = [#tpu.dimension_semantics<arbitrary>], iteration_bounds = array<i64: 1>, scalar_prefetch = 0 : i64, scratch_operands = 1 : i64, tpu.core_type = #tpu.core_type<tc>, window_params = [{transform_indices = @transform_0, window_bounds = array<i64: 2, 8, 32>}, {transform_indices = @transform_1, window_bounds = array<i64: 2, 8, 32>}, {transform_indices = @transform_2, window_bounds = array<i64: 2, 8, 32>}, {pipeline_mode = #tpu.pipeline_mode<synchronous>, transform_indices = @transform_3, window_bounds = array<i64: 32, 32>}, {pipeline_mode = #tpu.pipeline_mode<synchronous>, transform_indices = @transform_4, window_bounds = array<i64: 32, 32>}, {pipeline_mode = #tpu.pipeline_mode<synchronous>, transform_indices = @transform_5, window_bounds = array<i64: 32, 32>}, {pipeline_mode = #tpu.pipeline_mode<synchronous>, transform_indices = @transform_6, window_bounds = array<i64: 1, 32>}, {transform_indices = @transform_7, window_bounds = array<i64: 2, 8, 32>}]} {
    %c0_i32 = arith.constant 0 : i32
    %0 = arith.cmpi eq, %arg0, %c0_i32 : i32
    %1 = arith.extui %0 : i1 to i32
    %c0_i32_0 = arith.constant 0 : i32
    %2 = arith.cmpi ne, %1, %c0_i32_0 : i32
    scf.if %2 {
      %cst_40 = arith.constant 0.000000e+00 : f32
      %85 = vector.broadcast %cst_40 : f32 to vector<8x32xf32>
      %c0_41 = arith.constant 0 : index
      %c0_42 = arith.constant 0 : index
      %86 = vector.load %arg9[%c0_41, %c0_42] : memref<8x32xf32, #tpu.memory_space<vmem>>, vector<8x32xf32>
      tpu.vector_store %arg9[%c0_41, %c0_42], %85 {strides = array<i32>} : memref<8x32xf32, #tpu.memory_space<vmem>>, vector<8x32xf32>,
    } else {
    }
    %c0 = arith.constant 0 : index
    %c0_1 = arith.constant 0 : index
    %3 = vector.load %arg4[%c0, %c0_1] : memref<32x32xf32, #tpu.memory_space<vmem>>, vector<32x32xf32>
    %c0_2 = arith.constant 0 : index
    %c0_3 = arith.constant 0 : index
    %4 = vector.load %arg5[%c0_2, %c0_3] : memref<32x32xf32, #tpu.memory_space<vmem>>, vector<32x32xf32>
    %c0_4 = arith.constant 0 : index
    %c0_5 = arith.constant 0 : index
    %5 = vector.load %arg6[%c0_4, %c0_5] : memref<32x32xf32, #tpu.memory_space<vmem>>, vector<32x32xf32>
    %c0_6 = arith.constant 0 : index
    %c0_7 = arith.constant 0 : index
    %6 = vector.load %arg7[%c0_6, %c0_7] : memref<1x32xf32, #tpu.memory_space<vmem>>, vector<1x32xf32>
    %c0_8 = arith.constant 0 : index
    %c0_9 = arith.constant 0 : index
    %7 = vector.load %arg9[%c0_8, %c0_9] : memref<8x32xf32, #tpu.memory_space<vmem>>, vector<8x32xf32>
    %c0_i32_10 = arith.constant 0 : i32
    %8 = arith.index_cast %c0_i32_10 : i32 to index
    %c0_11 = arith.constant 0 : index
    %c0_12 = arith.constant 0 : index
    %9 = vector.load %arg1[%8, %c0_11, %c0_12] : memref<2x8x32xf32, #tpu.memory_space<vmem>>, vector<1x8x32xf32>
    %10 = vector.shape_cast %9 : vector<1x8x32xf32> to vector<8x32xf32>
    %11 = arith.index_cast %c0_i32_10 : i32 to index
    %c0_13 = arith.constant 0 : index
    %c0_14 = arith.constant 0 : index
    %12 = vector.load %arg2[%11, %c0_13, %c0_14] : memref<2x8x32xf32, #tpu.memory_space<vmem>>, vector<1x8x32xf32>
    %13 = vector.shape_cast %12 : vector<1x8x32xf32> to vector<8x32xf32>
    %14 = arith.index_cast %c0_i32_10 : i32 to index
    %c0_15 = arith.constant 0 : index
    %c0_16 = arith.constant 0 : index
    %15 = vector.load %arg3[%14, %c0_15, %c0_16] : memref<2x8x32xf32, #tpu.memory_space<vmem>>, vector<1x8x32xf32>
    %16 = vector.shape_cast %15 : vector<1x8x32xf32> to vector<8x32xf32>
    %cst = arith.constant dense<0.000000e+00> : vector<8x32xf32>
    %17 = tpu.matmul %7, %3, %cst {dimension_numbers = #tpu.dot_dimension_numbers<[1], [0], [0], [1], [0, 0, 1, 1], [], []>} : vector<8x32xf32>, vector<32x32xf32>, vector<8x32xf32> -> vector<8x32xf32>
    %18 = arith.addf %10, %17 : vector<8x32xf32>
    %19 = arith.negf %18 : vector<8x32xf32>
    %20 = math.exp %19 : vector<8x32xf32>
    %cst_17 = arith.constant 1.000000e+00 : f32
    %21 = vector.broadcast %cst_17 : f32 to vector<8x32xf32>
    %22 = arith.addf %21, %20 : vector<8x32xf32>
    %23 = arith.divf %21, %22 : vector<8x32xf32>
    %cst_18 = arith.constant dense<0.000000e+00> : vector<8x32xf32>
    %24 = tpu.matmul %7, %4, %cst_18 {dimension_numbers = #tpu.dot_dimension_numbers<[1], [0], [0], [1], [0, 0, 1, 1], [], []>} : vector<8x32xf32>, vector<32x32xf32>, vector<8x32xf32> -> vector<8x32xf32>
    %25 = arith.addf %13, %24 : vector<8x32xf32>
    %26 = arith.negf %25 : vector<8x32xf32>
    %27 = math.exp %26 : vector<8x32xf32>
    %cst_19 = arith.constant 1.000000e+00 : f32
    %28 = vector.broadcast %cst_19 : f32 to vector<8x32xf32>
    %29 = arith.addf %28, %27 : vector<8x32xf32>
    %30 = arith.divf %28, %29 : vector<8x32xf32>
    %cst_20 = arith.constant dense<0.000000e+00> : vector<8x32xf32>
    %31 = tpu.matmul %7, %5, %cst_20 {dimension_numbers = #tpu.dot_dimension_numbers<[1], [0], [0], [1], [0, 0, 1, 1], [], []>} : vector<8x32xf32>, vector<32x32xf32>, vector<8x32xf32> -> vector<8x32xf32>
    %32 = vector.broadcast %6 : vector<1x32xf32> to vector<8x32xf32>
    %33 = arith.addf %31, %32 : vector<8x32xf32>
    %34 = arith.mulf %23, %33 : vector<8x32xf32>
    %35 = arith.addf %16, %34 : vector<8x32xf32>
    %36 = math.tanh %35 : vector<8x32xf32>
    %cst_21 = arith.constant 1.000000e+00 : f32
    %37 = vector.broadcast %cst_21 : f32 to vector<8x32xf32>
    %38 = arith.subf %37, %30 : vector<8x32xf32>
    %39 = arith.mulf %38, %36 : vector<8x32xf32>
    %40 = arith.mulf %30, %7 : vector<8x32xf32>
    %41 = arith.addf %39, %40 : vector<8x32xf32>
    %42 = arith.index_cast %c0_i32_10 : i32 to index
    %c0_22 = arith.constant 0 : index
    %c0_23 = arith.constant 0 : index
    %43 = vector.load %arg8[%42, %c0_22, %c0_23] : memref<2x8x32xf32, #tpu.memory_space<vmem>>, vector<1x8x32xf32>
    %44 = vector.shape_cast %43 : vector<1x8x32xf32> to vector<8x32xf32>
    %45 = vector.shape_cast %41 : vector<8x32xf32> to vector<1x8x32xf32>
    tpu.vector_store %arg8[%42, %c0_22, %c0_23], %45 {strides = array<i32>} : memref<2x8x32xf32, #tpu.memory_space<vmem>>, vector<1x8x32xf32>,
    %c1_i32 = arith.constant 1 : i32
    %46 = arith.index_cast %c1_i32 : i32 to index
    %c0_24 = arith.constant 0 : index
    %c0_25 = arith.constant 0 : index
    %47 = vector.load %arg1[%46, %c0_24, %c0_25] : memref<2x8x32xf32, #tpu.memory_space<vmem>>, vector<1x8x32xf32>
    %48 = vector.shape_cast %47 : vector<1x8x32xf32> to vector<8x32xf32>
    %49 = arith.index_cast %c1_i32 : i32 to index
    %c0_26 = arith.constant 0 : index
    %c0_27 = arith.constant 0 : index
    %50 = vector.load %arg2[%49, %c0_26, %c0_27] : memref<2x8x32xf32, #tpu.memory_space<vmem>>, vector<1x8x32xf32>
    %51 = vector.shape_cast %50 : vector<1x8x32xf32> to vector<8x32xf32>
    %52 = arith.index_cast %c1_i32 : i32 to index
    %c0_28 = arith.constant 0 : index
    %c0_29 = arith.constant 0 : index
    %53 = vector.load %arg3[%52, %c0_28, %c0_29] : memref<2x8x32xf32, #tpu.memory_space<vmem>>, vector<1x8x32xf32>
    %54 = vector.shape_cast %53 : vector<1x8x32xf32> to vector<8x32xf32>
    %cst_30 = arith.constant dense<0.000000e+00> : vector<8x32xf32>
    %55 = tpu.matmul %41, %3, %cst_30 {dimension_numbers = #tpu.dot_dimension_numbers<[1], [0], [0], [1], [0, 0, 1, 1], [], []>} : vector<8x32xf32>, vector<32x32xf32>, vector<8x32xf32> -> vector<8x32xf32>
    %56 = arith.addf %48, %55 : vector<8x32xf32>
    %57 = arith.negf %56 : vector<8x32xf32>
    %58 = math.exp %57 : vector<8x32xf32>
    %cst_31 = arith.constant 1.000000e+00 : f32
    %59 = vector.broadcast %cst_31 : f32 to vector<8x32xf32>
    %60 = arith.addf %59, %58 : vector<8x32xf32>
    %61 = arith.divf %59, %60 : vector<8x32xf32>
    %cst_32 = arith.constant dense<0.000000e+00> : vector<8x32xf32>
    %62 = tpu.matmul %41, %4, %cst_32 {dimension_numbers = #tpu.dot_dimension_numbers<[1], [0], [0], [1], [0, 0, 1, 1], [], []>} : vector<8x32xf32>, vector<32x32xf32>, vector<8x32xf32> -> vector<8x32xf32>
    %63 = arith.addf %51, %62 : vector<8x32xf32>
    %64 = arith.negf %63 : vector<8x32xf32>
    %65 = math.exp %64 : vector<8x32xf32>
    %cst_33 = arith.constant 1.000000e+00 : f32
    %66 = vector.broadcast %cst_33 : f32 to vector<8x32xf32>
    %67 = arith.addf %66, %65 : vector<8x32xf32>
    %68 = arith.divf %66, %67 : vector<8x32xf32>
    %cst_34 = arith.constant dense<0.000000e+00> : vector<8x32xf32>
    %69 = tpu.matmul %41, %5, %cst_34 {dimension_numbers = #tpu.dot_dimension_numbers<[1], [0], [0], [1], [0, 0, 1, 1], [], []>} : vector<8x32xf32>, vector<32x32xf32>, vector<8x32xf32> -> vector<8x32xf32>
    %70 = vector.broadcast %6 : vector<1x32xf32> to vector<8x32xf32>
    %71 = arith.addf %69, %70 : vector<8x32xf32>
    %72 = arith.mulf %61, %71 : vector<8x32xf32>
    %73 = arith.addf %54, %72 : vector<8x32xf32>
    %74 = math.tanh %73 : vector<8x32xf32>
    %cst_35 = arith.constant 1.000000e+00 : f32
    %75 = vector.broadcast %cst_35 : f32 to vector<8x32xf32>
    %76 = arith.subf %75, %68 : vector<8x32xf32>
    %77 = arith.mulf %76, %74 : vector<8x32xf32>
    %78 = arith.mulf %68, %41 : vector<8x32xf32>
    %79 = arith.addf %77, %78 : vector<8x32xf32>
    %80 = arith.index_cast %c1_i32 : i32 to index
    %c0_36 = arith.constant 0 : index
    %c0_37 = arith.constant 0 : index
    %81 = vector.load %arg8[%80, %c0_36, %c0_37] : memref<2x8x32xf32, #tpu.memory_space<vmem>>, vector<1x8x32xf32>
    %82 = vector.shape_cast %81 : vector<1x8x32xf32> to vector<8x32xf32>
    %83 = vector.shape_cast %79 : vector<8x32xf32> to vector<1x8x32xf32>
    tpu.vector_store %arg8[%80, %c0_36, %c0_37], %83 {strides = array<i32>} : memref<2x8x32xf32, #tpu.memory_space<vmem>>, vector<1x8x32xf32>,
    %c2_i32 = arith.constant 2 : i32
    %c0_38 = arith.constant 0 : index
    %c0_39 = arith.constant 0 : index
    %84 = vector.load %arg9[%c0_38, %c0_39] : memref<8x32xf32, #tpu.memory_space<vmem>>, vector<8x32xf32>
    tpu.vector_store %arg9[%c0_38, %c0_39], %79 {strides = array<i32>} : memref<8x32xf32, #tpu.memory_space<vmem>>, vector<8x32xf32>,
    return
  }
  func.func @transform_0(%arg0: i32) -> (i32, i32, i32) {
    %c0_i32 = arith.constant 0 : i32
    %c0_i32_0 = arith.constant 0 : i32
    %c0_i32_1 = arith.constant 0 : i32
    return %arg0, %c0_i32, %c0_i32_0 : i32, i32, i32
  }
  func.func @transform_1(%arg0: i32) -> (i32, i32, i32) {
    %c0_i32 = arith.constant 0 : i32
    %c0_i32_0 = arith.constant 0 : i32
    %c0_i32_1 = arith.constant 0 : i32
    return %arg0, %c0_i32, %c0_i32_0 : i32, i32, i32
  }
  func.func @transform_2(%arg0: i32) -> (i32, i32, i32) {
    %c0_i32 = arith.constant 0 : i32
    %c0_i32_0 = arith.constant 0 : i32
    %c0_i32_1 = arith.constant 0 : i32
    return %arg0, %c0_i32, %c0_i32_0 : i32, i32, i32
  }
  func.func @transform_3(%arg0: i32) -> (i32, i32) {
    %c0_i32 = arith.constant 0 : i32
    %c0_i32_0 = arith.constant 0 : i32
    %c0_i32_1 = arith.constant 0 : i32
    return %c0_i32, %c0_i32_0 : i32, i32
  }
  func.func @transform_4(%arg0: i32) -> (i32, i32) {
    %c0_i32 = arith.constant 0 : i32
    %c0_i32_0 = arith.constant 0 : i32
    %c0_i32_1 = arith.constant 0 : i32
    return %c0_i32, %c0_i32_0 : i32, i32
  }
  func.func @transform_5(%arg0: i32) -> (i32, i32) {
    %c0_i32 = arith.constant 0 : i32
    %c0_i32_0 = arith.constant 0 : i32
    %c0_i32_1 = arith.constant 0 : i32
    return %c0_i32, %c0_i32_0 : i32, i32
  }
  func.func @transform_6(%arg0: i32) -> (i32, i32) {
    %c0_i32 = arith.constant 0 : i32
    %c0_i32_0 = arith.constant 0 : i32
    %c0_i32_1 = arith.constant 0 : i32
    return %c0_i32, %c0_i32_0 : i32, i32
  }
  func.func @transform_7(%arg0: i32) -> (i32, i32, i32) {
    %c0_i32 = arith.constant 0 : i32
    %c0_i32_0 = arith.constant 0 : i32
    %c0_i32_1 = arith.constant 0 : i32
    return %arg0, %c0_i32, %c0_i32_0 : i32, i32, i32
  }
}

</mosaic_0001>

<bundles_post_ra>
// kernel: tpu_custom_call.1
= control target key start
LH: loop header
LB: loop body
LE: loop exit
PB: predicated region body
PF: predicated region fallthrough
CT: control target
= control target key end

     0   :  { %12 = vsyncpa [#allocation4], 0  ;;  %s1192_s0 = inlined_call_operand.hbm [shape: f32[2,8,32], index: 0, kind: input, shape index: {}]   ;;  %s1193_s1 = inlined_call_operand.hbm [shape: f32[2,8,32], index: 1, kind: input, shape index: {}]   ;;  %s1194_s2 = inlined_call_operand.hbm [shape: f32[2,8,32], index: 2, kind: input, shape index: {}]   ;;  %s1195_s3 = inlined_call_operand.hbm [shape: f32[32,32], index: 3, kind: input, shape index: {}]   ;;  %s1196_s4 = inlined_call_operand.hbm [shape: f32[32,32], index: 4, kind: input, shape index: {}]   ;;  %s1197_s5 = inlined_call_operand.hbm [shape: f32[32,32], index: 5, kind: input, shape index: {}]   ;;  %s1198_s6 = inlined_call_operand.vmem [shape: f32[1,32], index: 6, kind: input, shape index: {}]   ;;  %s1199_s7 = inlined_call_operand.hbm [shape: f32[2,8,32], index: 7, kind: output, shape index: {}]  }
   0x1   :  { %13 = vsyncpa [#allocation7], 0 }
   0x2   :  { %14 = vsyncpa [#allocation10], 0 }
   0x3   :  { %15 = vsyncpa [#allocation13], 0 }
   0x4   :  { %16 = vsyncpa [#allocation5], 0  ;;  %s976_s24 = smov [#allocation6]   ;;  %s977_s26 = smov [#allocation9]  }
   0x5   :  { %s34_s25 = sshll.u32 %s976_s24, 4  ;;  %s58_s27 = sshll.u32 %s977_s26, 4  ;;  %s35_s25 = int_to_ptr.vmem [resolvable:$true] %s34_s25  ;;  %s1028_s27 = int_to_ptr.vmem [resolvable:$true] %s58_s27 }
   0x6   :  { %s812_s30 = scalar_lea.hbm %s1193_s1, 256 }
   0x7   :  { %p813_p0 = scmp.ne.s32.totalorder %s1193_s1, %s812_s30  ;;  %p816_p1 = scmp.lt.u32.totalorder %s812_s30, %s1193_s1 }
   0x9   :  { %p818_p2 = pnand %p816_p1, %p813_p0 }
   0xb   :  { %821 = shalt.err (!%p818_p2)
}
   0xc   :  { %s822_s12 = scalar_lea.vmem %s35_s25, 256  ;;  %p827_p4 = scmp.lt.s32.totalorder %s35_s25, %s35_s25 }
   0xd   :  { %p823_p3 = scmp.ne.s32.totalorder %s35_s25, %s822_s12  ;;  %p828_p5 = scmp.lt.s32.totalorder %s822_s12, %s822_s12 }
   0xf   :  { %p829_p6 = por %p828_p5, %p827_p4 }
  0x11   :  { %p830_p7 = pnand %p829_p6, %p823_p3 }
  0x13   :  { %833 = shalt.err (!%p830_p7)
}
  0x14   :  { %s978_s13 = smov 128   ;;  %s979_s14 = smov 8  }
  0x15   :  { %40 = dma.hbm_to_vmem [thread:$0]  %s1193_s1, 256, %s35_s25, [#allocation7], %s978_s13, %s978_s13, %s979_s14  }
  0x16   :  { %s834_s19 = scalar_lea.hbm %s1195_s3, 512 }
  0x17   :  { %p835_p8 = scmp.ne.s32.totalorder %s1195_s3, %s834_s19  ;;  %p838_p9 = scmp.lt.u32.totalorder %s834_s19, %s1195_s3 }
  0x19   :  { %p840_p10 = pnand %p838_p9, %p835_p8 }
  0x1b   :  { %843 = shalt.err (!%p840_p10)
}
  0x1c   :  { %s844_s24 = scalar_lea.vmem %s1028_s27, 512  ;;  %p849_p12 = scmp.lt.s32.totalorder %s1028_s27, %s1028_s27 }
  0x1d   :  { %p845_p11 = scmp.ne.s32.totalorder %s1028_s27, %s844_s24  ;;  %p850_p13 = scmp.lt.s32.totalorder %s844_s24, %s844_s24 }
  0x1f   :  { %p851_p0 = por %p850_p13, %p849_p12 }
  0x21   :  { %p852_p1 = pnand %p851_p0, %p845_p11 }
  0x23   :  { %855 = shalt.err (!%p852_p1)
}
  0x24   :  { %64 = dma.hbm_to_vmem [thread:$0]  %s1195_s3, 512, %s1028_s27, [#allocation10], %s978_s13, %s978_s13, %s979_s14  }
  0x25   :  { %s980_s26 = smov [#allocation3]   ;;  %s981_s29 = smov [#allocation8]  }
  0x26   :  { %s22_s28 = sshll.u32 %s980_s26, 4  ;;  %s46_s30 = sshll.u32 %s981_s29, 4  ;;  %s23_s28 = int_to_ptr.vmem [resolvable:$true] %s22_s28  ;;  %s1065_s30 = int_to_ptr.vmem [resolvable:$true] %s46_s30 }
  0x27   :  { %s856_s10 = scalar_lea.hbm %s1192_s0, 256 }
  0x28   :  { %p857_p2 = scmp.ne.s32.totalorder %s1192_s0, %s856_s10  ;;  %p860_p3 = scmp.lt.u32.totalorder %s856_s10, %s1192_s0 }
  0x2a   :  { %p862_p4 = pnand %p860_p3, %p857_p2 }
  0x2c   :  { %865 = shalt.err (!%p862_p4)
}
  0x2d   :  { %s866_s3 = scalar_lea.vmem %s23_s28, 256  ;;  %p871_p6 = scmp.lt.s32.totalorder %s23_s28, %s23_s28 }
  0x2e   :  { %p867_p5 = scmp.ne.s32.totalorder %s23_s28, %s866_s3  ;;  %p872_p7 = scmp.lt.s32.totalorder %s866_s3, %s866_s3 }
  0x30   :  { %p873_p8 = por %p872_p7, %p871_p6 }
  0x32   :  { %p874_p9 = pnand %p873_p8, %p867_p5 }
  0x34   :  { %877 = shalt.err (!%p874_p9)
}
  0x35   :  { %28 = dma.hbm_to_vmem [thread:$0]  %s1192_s0, 256, %s23_s28, [#allocation4], %s978_s13, %s978_s13, %s979_s14  }
  0x36   :  { %s878_s20 = scalar_lea.hbm %s1194_s2, 256 }
  0x37   :  { %p879_p10 = scmp.ne.s32.totalorder %s1194_s2, %s878_s20  ;;  %p882_p11 = scmp.lt.u32.totalorder %s878_s20, %s1194_s2 }
  0x39   :  { %p884_p12 = pnand %p882_p11, %p879_p10 }
  0x3b   :  { %887 = shalt.err (!%p884_p12)
}
  0x3c   :  { %s888_s1 = scalar_lea.vmem %s1065_s30, 256  ;;  %p893_p0 = scmp.lt.s32.totalorder %s1065_s30, %s1065_s30 }
  0x3d   :  { %p889_p13 = scmp.ne.s32.totalorder %s1065_s30, %s888_s1  ;;  %p894_p1 = scmp.lt.s32.totalorder %s888_s1, %s888_s1 }
  0x3f   :  { %p895_p2 = por %p894_p1, %p893_p0 }
  0x41   :  { %p896_p3 = pnand %p895_p2, %p889_p13 }
  0x43   :  { %899 = shalt.err (!%p896_p3)
}
  0x44   :  { %52 = dma.hbm_to_vmem [thread:$0]  %s1194_s2, 256, %s1065_s30, [#allocation7], %s978_s13, %s978_s13, %s979_s14  }
  0x45   :  { %s982_s26 = smov [#allocation11]   ;;  %s983_s29 = smov [#allocation12]  }
  0x46   :  { %s70_s28 = sshll.u32 %s982_s26, 4  ;;  %s82_s8 = sshll.u32 %s983_s29, 4  ;;  %s71_s28 = int_to_ptr.vmem [resolvable:$true] %s70_s28  ;;  %s1102_s8 = int_to_ptr.vmem [resolvable:$true] %s82_s8 }
  0x47   :  { %s900_s11 = scalar_lea.hbm %s1196_s4, 512 }
  0x48   :  { %p901_p4 = scmp.ne.s32.totalorder %s1196_s4, %s900_s11  ;;  %p904_p5 = scmp.lt.u32.totalorder %s900_s11, %s1196_s4 }
  0x4a   :  { %p906_p6 = pnand %p904_p5, %p901_p4 }
  0x4c   :  { %909 = shalt.err (!%p906_p6)
}
  0x4d   :  { %s910_s2 = scalar_lea.vmem %s71_s28, 512  ;;  %p915_p8 = scmp.lt.s32.totalorder %s71_s28, %s71_s28 }
  0x4e   :  { %p911_p7 = scmp.ne.s32.totalorder %s71_s28, %s910_s2  ;;  %p916_p9 = scmp.lt.s32.totalorder %s910_s2, %s910_s2 }
  0x50   :  { %p917_p10 = por %p916_p9, %p915_p8 }
  0x52   :  { %p918_p11 = pnand %p917_p10, %p911_p7 }
  0x54   :  { %921 = shalt.err (!%p918_p11)
}
  0x55   :  { %76 = dma.hbm_to_vmem [thread:$0]  %s1196_s4, 512, %s71_s28, [#allocation10], %s978_s13, %s978_s13, %s979_s14  }
  0x56   :  { %s922_s19 = scalar_lea.hbm %s1197_s5, 512 }
  0x57   :  { %p923_p12 = scmp.ne.s32.totalorder %s1197_s5, %s922_s19  ;;  %p926_p13 = scmp.lt.u32.totalorder %s922_s19, %s1197_s5 }
  0x59   :  { %p928_p0 = pnand %p926_p13, %p923_p12 }
  0x5b   :  { %931 = shalt.err (!%p928_p0)
}
  0x5c   :  { %s932_s24 = scalar_lea.vmem %s1102_s8, 512  ;;  %p937_p2 = scmp.lt.s32.totalorder %s1102_s8, %s1102_s8 }
  0x5d   :  { %p933_p1 = scmp.ne.s32.totalorder %s1102_s8, %s932_s24  ;;  %p938_p3 = scmp.lt.s32.totalorder %s932_s24, %s932_s24 }
  0x5f   :  { %p939_p4 = por %p938_p3, %p937_p2 }
  0x61   :  { %p940_p5 = pnand %p939_p4, %p933_p1 }
  0x63   :  { %943 = shalt.err (!%p940_p5)
}
  0x64   :  { %88 = dma.hbm_to_vmem [thread:$0]  %s1197_s5, 512, %s1102_s8, [#allocation13], %s978_s13, %s978_s13, %s979_s14  }
  0x65   :  { %966 = dma.done.wait [#allocation4], 256  }
  0x66   :  { %967 = vsyncadd [#allocation4], 4294967040 }
  0x67   :  { %968 = dma.done.wait [#allocation7], 512  }
  0x68   :  { %969 = vsyncadd [#allocation7], 4294966784 }
  0x69   :  { %970 = dma.done.wait [#allocation10], 1024  }
  0x6a   :  { %971 = vsyncadd [#allocation10], 4294966272 }
  0x6b   :  { %972 = dma.done.wait [#allocation13], 512  }
  0x6c   :  { %973 = vsyncadd [#allocation13], 4294966784  ;;  %vm113_vm0 = vcmask 261120   ;;  %v984_v0 = vmov 0.0|0.0   ;;  %v985_v1 = vmov 0.0   ;;  %vm986_vm1 = vmmov 0  }
  0x6d   :  { %744 = vmatprep.subr.bf16.mxu0 %v984_v0  ;;  %114 = vst.msk [vmem:[#allocation2] sm:$0xff] %vm113_vm0, %v985_v1  ;;  %686 = vmatprep.mubr.msk.f32.mxu0 %vm986_vm1, %v985_v1  ;;  %v115_v2 = vld [vmem:[#allocation9] sm:$0xff]  ;;  %v116_v3 = vld [vmem:[#allocation9 + $0x8] sm:$0xff]  ;;  %v117_v4 = vld [vmem:[#allocation9 + $0x10] sm:$0xff] }
  0x6e   :  { %750 = vmatprep.subr.bf16.mxu1 %v984_v0  ;;  %697 = vmatprep.mubr.msk.f32.mxu1 %vm986_vm1, %v985_v1  ;;  %v745_v5 = vpack.c.bf16 %v116_v3, %v115_v2  ;;  %v118_v6 = vld [vmem:[#allocation9 + $0x18] sm:$0xff]  ;;  %v119_v7 = vld [vmem:[#allocation11] sm:$0xff]  ;;  %v120_v8 = vld [vmem:[#allocation11 + $0x8] sm:$0xff] }
  0x6f   :  { %v121_v9 = vld [vmem:[#allocation11 + $0x10] sm:$0xff]  ;;  %v122_v10 = vld [vmem:[#allocation11 + $0x18] sm:$0xff]  ;;  %v748_v11 = vpack.c.bf16 %v118_v6, %v117_v4  ;;  %v751_v12 = vpack.c.bf16 %v120_v8, %v119_v7  ;;  %v123_v13 = vld [vmem:[#allocation12] sm:$0xff] }
  0x70   :  { %746 = vmatpush3.bf16.msra.mxu0 %v745_v5  ;;  %v124_v14 = vld [vmem:[#allocation12 + $0x8] sm:$0xff]  ;;  %v754_v15 = vpack.c.bf16 %v122_v10, %v121_v9  ;;  %v125_v18 = vld [vmem:[#allocation12 + $0x10] sm:$0xff]  ;;  %v126_v19 = vld [vmem:[#allocation12 + $0x18] sm:$0xff] }
  0x71   :  { %747 = vmatprep.subr.bf16.mxu0 %v984_v0  ;;  %752 = vmatpush3.bf16.msra.mxu1 %v751_v12  ;;  %v757_v17 = vpack.c.bf16 %v124_v14, %v123_v13  ;;  %v760_v20 = vpack.c.bf16 %v126_v19, %v125_v18  ;;  %v129_v21 = vld [vmem:[#allocation3] sm:$0xff]  ;;  %v130_v23 = vld [vmem:[#allocation6] sm:$0xff]  ;;  %v641_v36 = vld [vmem:[%s1198_s6] ss:$0 sm:$0xff]  ;;  %s987_s6 = smov [#allocation14]  }
  0x72   :  { %753 = vmatprep.subr.bf16.mxu1 %v984_v0  ;;  %v131_v40 = vld [vmem:[#allocation8] sm:$0xff]  ;;  %v375_v49 = vld [vmem:[#allocation3 + $0x8] sm:$0xff]  ;;  %v377_v53 = vld [vmem:[#allocation6 + $0x8] sm:$0xff]  ;;  %s622_s25 = sshll.u32 %s987_s6, 4  ;;  %s623_s25 = int_to_ptr.vmem [resolvable:$true] %s622_s25 }
  0x73   :  { %v379_v3 = vld [vmem:[#allocation8 + $0x8] sm:$0xff]  ;;  %s944_s26 = scalar_lea.vmem %s623_s25, 256  ;;  %p949_p7 = scmp.lt.s32.totalorder %s623_s25, %s623_s25 }
  0x74   :  { %749 = vmatpush3.bf16.msra.mxu0 %v748_v11  ;;  %v128_v16 = vld [vmem:[#allocation2] sm:$0xff]  ;;  %p945_p6 = scmp.ne.s32.totalorder %s623_s25, %s944_s26  ;;  %p950_p8 = scmp.lt.s32.totalorder %s944_s26, %s944_s26 }
  0x75   :  { %756 = vmatprep.subr.bf16.mxu0 %v984_v0  ;;  %755 = vmatpush3.bf16.msra.mxu1 %v754_v15 }
  0x76   :  { %762 = vmatprep.subr.bf16.mxu1 %v984_v0  ;;  %p951_p9 = por %p950_p8, %p949_p7 }
  0x77   :  { %687 = vmatmul.mubr.msk.f32.vlgmr.msra.gmra.mrb[0].mxu0 %vm113_vm0, %v128_v16 }
  0x78   :  { %758 = vmatpush3.bf16.msra.mxu0 %v757_v17  ;;  %708 = vmatprep.mubr.msk.f32.mxu0 %vm986_vm1, %v985_v1  ;;  %p952_p10 = pnand %p951_p9, %p945_p6 }
  0x79   :  { %698 = vmatmul.mubr.msk.f32.vlgmr.msra.gmra.mrb[0].mxu1 %vm113_vm0, %v128_v16  ;;  %759 = vmatprep.subr.bf16.mxu0 %v984_v0 }
  0x7a   :  { %764 = vmatpush3.bf16.msra.mxu1 %v745_v5  ;;  %719 = vmatprep.mubr.msk.f32.mxu1 %vm986_vm1, %v985_v1 }
  0x7b   :  { %765 = vmatprep.subr.bf16.mxu1 %v984_v0 }
  0x7c   :  { %761 = vmatpush3.bf16.msra.mxu0 %v760_v20 }
  0x7d   :  { %768 = vmatprep.subr.bf16.mxu0 %v984_v0 }
  0x7e   :  { %767 = vmatpush3.bf16.msra.mxu1 %v748_v11 }
  0x7f   :  { %709 = vmatmul.mubr.msk.f32.vlgmr.msra.gmra.mrb[2].mxu0 %vm113_vm0, %v128_v16  ;;  %774 = vmatprep.subr.bf16.mxu1 %v984_v0 }
  0x80   :  { %770 = vmatpush3.bf16.msra.mxu0 %v751_v12  ;;  %730 = vmatprep.mubr.msk.f32.mxu0 %vm986_vm1, %v985_v1 }
  0x81   :  { %771 = vmatprep.subr.bf16.mxu0 %v984_v0 }
  0x84   :  { %773 = vmatpush3.bf16.msra.mxu0 %v754_v15 }
 0x14a   :  { %v202_v22 = vpop.f32.mrb[0].mxu0 }
 0x14b   :  { %v206_v24 = vadd.f32 %v202_v22, %v129_v21  ;;  %v688_v25 = vpop.f32.mrb[1].mxu0 }
 0x14c   :  { %v279_v26 = vpop.f32.mrb[0].mxu1 }
 0x14d   :  { %v638_v27 = vmul.f32 -1.442695, %v206_v24  ;;  %v283_v28 = vadd.f32 %v279_v26, %v130_v23  ;;  %v699_v29 = vpop.f32.mrb[1].mxu1 }
 0x14f   :  { %792 = vpow2.f32 %v638_v27  ;;  %v640_v30 = vmul.f32 -1.442695, %v283_v28 }
 0x151   :  { %794 = vpow2.f32 %v640_v30 }
 0x152   :  { %v362_v31 = vpop.f32.mrb[2].mxu0 }
 0x153   :  { %v710_v32 = vpop.f32.mrb[3].mxu0  ;;  %v363_v38 = vadd.f32 %v641_v36, %v362_v31 }
 0x159   :  { %v793_v33 = vpop.eup %792 }
 0x15a   :  { %v210_v34 = vadd.f32 1.0, %v793_v33 }
 0x15b   :  { %v795_v35 = vpop.eup %794 }
 0x15c   :  { %796 = vrcp.f32 %v210_v34  ;;  %v287_v37 = vadd.f32 1.0, %v795_v35 }
 0x15e   :  { %798 = vrcp.f32 %v287_v37 }
 0x166   :  { %v797_v39 = vpop.eup %796 }
 0x167   :  { %v366_v41 = vmul.f32 %v797_v39, %v363_v38 }
 0x168   :  { %v799_v43 = vpop.eup %798 }
 0x169   :  { %v367_v42 = vadd.f32 %v366_v41, %v131_v40  ;;  %v369_v44 = vsub.f32 1.0, %v799_v43  ;;  %v371_v47 = vmul.f32 %v799_v43, %v128_v16 }
 0x16b   :  { %800 = vtanh.f32 %v367_v42 }
 0x175   :  { %v801_v45 = vpop.eup %800 }
 0x176   :  { %v370_v46 = vmul.f32 %v801_v45, %v369_v44 }
 0x178   :  { %v372_v48 = vadd.f32 %v371_v47, %v370_v46 }
 0x17a   :  { %720 = vmatmul.mubr.msk.f32.vlgmr.msra.gmra.mrb[2].mxu1 %vm113_vm0, %v372_v48  ;;  %373 = vst.msk [vmem:[#allocation14] sm:$0xff] %vm113_vm0, %v372_v48  ;;  %731 = vmatmul.mubr.msk.f32.vlgmr.msra.gmra.mrb[4].mxu0 %vm113_vm0, %v372_v48 }
 0x17b   :  { %776 = vmatpush3.bf16.msra.mxu1 %v757_v17  ;;  %741 = vmatprep.mubr.msk.f32.mxu1 %vm986_vm1, %v985_v1 }
 0x17c   :  { %777 = vmatprep.subr.bf16.mxu1 %v984_v0 }
 0x17f   :  { %779 = vmatpush3.bf16.msra.mxu1 %v760_v20 }
 0x182   :  { %742 = vmatmul.mubr.msk.f32.vlgmr.msra.gmra.mrb[4].mxu1 %vm113_vm0, %v372_v48 }
 0x24d   :  { %v449_v50 = vpop.f32.mrb[2].mxu1  ;;  %v526_v51 = vpop.f32.mrb[4].mxu0 }
 0x24e   :  { %v453_v52 = vadd.f32 %v449_v50, %v375_v49  ;;  %v721_v54 = vpop.f32.mrb[3].mxu1  ;;  %v732_v55 = vpop.f32.mrb[5].mxu0  ;;  %v530_v57 = vadd.f32 %v526_v51, %v377_v53 }
 0x250   :  { %v644_v56 = vmul.f32 -1.442695, %v453_v52  ;;  %v646_v58 = vmul.f32 -1.442695, %v530_v57 }
 0x252   :  { %802 = vpow2.f32 %v644_v56 }
 0x253   :  { %804 = vpow2.f32 %v646_v58 }
 0x255   :  { %v603_v59 = vpop.f32.mrb[4].mxu1 }
 0x256   :  { %v743_v60 = vpop.f32.mrb[5].mxu1  ;;  %v604_v1 = vadd.f32 %v641_v36, %v603_v59 }
 0x25c   :  { %v803_v61 = vpop.eup %802 }
 0x25d   :  { %v457_v62 = vadd.f32 1.0, %v803_v61  ;;  %v805_v63 = vpop.eup %804 }
 0x25e   :  { %v534_v0 = vadd.f32 1.0, %v805_v63 }
 0x25f   :  { %806 = vrcp.f32 %v457_v62 }
 0x260   :  { %808 = vrcp.f32 %v534_v0 }
 0x269   :  { %v807_v2 = vpop.eup %806 }
 0x26a   :  { %v607_v4 = vmul.f32 %v807_v2, %v604_v1  ;;  %v809_v6 = vpop.eup %808 }
 0x26b   :  { %v610_v7 = vsub.f32 1.0, %v809_v6  ;;  %v612_v10 = vmul.f32 %v809_v6, %v372_v48 }
 0x26c   :  { %v608_v5 = vadd.f32 %v607_v4, %v379_v3 }
 0x26e   :  { %810 = vtanh.f32 %v608_v5 }
 0x278   :  { %v811_v8 = vpop.eup %810 }
 0x279   :  { %v611_v9 = vmul.f32 %v811_v8, %v610_v7 }
 0x27b   :  { %v613_v11 = vadd.f32 %v612_v10, %v611_v9 }
 0x27d   :  { %615 = vst.msk [vmem:[#allocation14 + $0x8] sm:$0xff] %vm113_vm0, %v613_v11  ;;  %616 = vst.msk [vmem:[#allocation2] sm:$0xff] %vm113_vm0, %v613_v11 }
 0x27e   :  { %955 = shalt.err (!%p952_p10)
}
 0x27f   :  { %s956_s8 = scalar_lea.hbm %s1199_s7, 256 }
 0x280   :  { %p957_p11 = scmp.ne.s32.totalorder %s1199_s7, %s956_s8  ;;  %p960_p12 = scmp.lt.u32.totalorder %s956_s8, %s1199_s7 }
 0x282   :  { %p962_p13 = pnand %p960_p12, %p957_p11 }
 0x284   :  { %965 = shalt.err (!%p962_p13)
}
 0x285   :  { %628 = dma.vmem_to_hbm [thread:$0]  %s623_s25, 256, %s1199_s7, [#allocation5], %s978_s13, %s978_s13, %s979_s14  }
 0x286   :  { %974 = dma.done.wait [#allocation5], 256  }
 0x287   :  { %975 = vsyncadd [#allocation5], 4294967040 }
 0x288   :  { %632 = vsyncpa [#allocation4], 1 }
 0x289   :  { %633 = vsyncpa [#allocation7], 1 }
 0x28a   :  { %634 = vsyncpa [#allocation10], 1 }
 0x28b   :  { %635 = vsyncpa [#allocation13], 1 }
 0x28c   :  { %636 = vsyncpa [#allocation5], 1 }

</bundles_post_ra>
